<compile_context>
chip_gen: v7x
topology: tpu7x:2x2x1
jax: 0.10.0
libtpu: 0.0.40
codegen_flags: <defaults>
</compile_context>

<pallas_src>
import numpy as np
import jax
import jax.numpy as jnp
from jax.experimental import pallas as pl
from jax.experimental.pallas import tpu as pltpu


# -----------------------------------------------------------------------------
# Primary path: zero-copy identity via input/output aliasing.
# -----------------------------------------------------------------------------
def _identity_alias_kernel(x_hbm_ref, o_hbm_ref):
    # NOTE: this body is intentionally empty.  Correctness rests ENTIRELY on
    # input_output_aliases={0: 0} below making the output buffer *be* the
    # input buffer.  If the aliasing is ever removed (e.g. a non-donatable
    # input path), do NOT keep this kernel — switch to
    # _gru_net_forward_dma_copy, otherwise the output is uninitialized.
    del x_hbm_ref, o_hbm_ref


def _gru_net_forward_aliased(x):
    return pl.pallas_call(
        _identity_alias_kernel,
        out_shape=jax.ShapeDtypeStruct(x.shape, x.dtype),
        # Keep both operands resident in HBM: no BlockSpec pipeline, no VMEM
        # staging, no (8,128) tiling constraint, no per-grid-step overhead
        # (empty grid — single trivial invocation).
        in_specs=[pl.BlockSpec(memory_space=pl.ANY)],
        out_specs=pl.BlockSpec(memory_space=pl.ANY),
        # Output 0 aliases input 0 -> identity already materialized in place.
        input_output_aliases={0: 0},
        # Declare zero cost so XLA never pessimizes async scheduling/overlap
        # of surrounding ops around this opaque custom call.
        cost_estimate=pl.CostEstimate(flops=0, transcendentals=0,
                                      bytes_accessed=0),
    )(x)


# Donation is what makes the aliased path truly zero-copy: without it XLA
# materializes a defensive full HBM->HBM copy in front of the aliased call
# (the only real cost of this kernel).  Callers must not reuse `x` afterwards.
gru_net_forward = jax.jit(_gru_net_forward_aliased, donate_argnums=0)


# -----------------------------------------------------------------------------
# Hardened fallback: materialized copy as chunked, concurrent HBM->HBM DMAs.
# Used only when aliasing / donation is not allowed.
# -----------------------------------------------------------------------------
def _make_dma_copy_kernel(n_chunks):
    def _dma_copy_kernel(x_hbm_ref, o_hbm_ref, sems):
        # Start every chunk DMA before waiting on any, so per-descriptor
        # latency overlaps and HBM saturates sooner (matters most at v7x's
        # 3.2 TB/s).
        copies = [
            pltpu.make_async_copy(x_hbm_ref.at[c], o_hbm_ref.at[c], sems.at[c])
            for c in range(n_chunks)
        ]
        for cp in copies:
            cp.start()
        for cp in copies:
            cp.wait()
    return _dma_copy_kernel


def _gru_net_forward_dma_copy(x, n_chunks_hint=8):
    """Identity with a materialized output buffer (no aliasing).

    Pure HBM->HBM DMA: no VMEM staging, no vreg load/store copy (so no v5e
    single-store-slot / lane-sparse vst.msk penalty), no (8,128) padding.
    """
    # TODO(synk): on v7x, shard the chunk ranges across both TensorCores
    # (grid=(2,) with dimension_semantics=("parallel",)) for very large
    # tensors; a single-TC issue stream is plenty for small inputs like these.
    n = x.size
    # Present a lane-dense slab (last dim 128) when possible so any future
    # staged/casting variant of this path starts from a sane layout.
    flat = x.reshape(n // 128, 128) if n % 128 == 0 else x.reshape(1, n)
    rows = flat.shape[0]
    n_chunks = 1
    for c in (n_chunks_hint, 4, 2, 1):
        if c >= 1 and rows % c == 0:
            n_chunks = c
            break
    chunked = flat.reshape(n_chunks, rows // n_chunks, flat.shape[1])

    out = pl.pallas_call(
        _make_dma_copy_kernel(n_chunks),
        out_shape=jax.ShapeDtypeStruct(chunked.shape, chunked.dtype),
        in_specs=[pl.BlockSpec(memory_space=pl.ANY)],
        out_specs=pl.BlockSpec(memory_space=pl.ANY),
        scratch_shapes=[pltpu.SemaphoreType.DMA((n_chunks,))],
        cost_estimate=pl.CostEstimate(
            flops=0, transcendentals=0,
            bytes_accessed=2 * x.size * x.dtype.itemsize),
    )(chunked)
    return out.reshape(x.shape)


# TODO(synk): the module declares `nn.LSTM()` (not constructible without
# input_size/hidden_size) and never uses it in forward(); no LSTM compute is
# faked here — forward is exactly the identity.


if __name__ == "__main__":
    key = jax.random.PRNGKey(0)
    # Small NCHW input consistent with a generic forward(x) signature.
    x = jax.random.normal(key, (2, 4, 16, 16), dtype=jnp.float32)

    # Host-side reference copy taken BEFORE the call: `x` is donated below and
    # must not be reused afterwards.
    x_host = np.asarray(x)

    # Primary zero-copy path (donated input -> no defensive copy, 0 HBM bytes).
    y = gru_net_forward(x)
    y = jax.block_until_ready(y)
    assert y.shape == x_host.shape
    assert y.dtype == x_host.dtype
    assert np.array_equal(np.asarray(y), x_host)

    # Hardened DMA-copy fallback (only needed when aliasing is disallowed).
    x2 = jnp.asarray(x_host)
    y2 = jax.block_until_ready(_gru_net_forward_dma_copy(x2))
    assert y2.shape == x_host.shape
    assert y2.dtype == x_host.dtype
    assert np.array_equal(np.asarray(y2), x_host)

    print("KERNEL_OK")
</pallas_src>

<mosaic_0001>
module attributes {stable_mosaic.version = 11 : i64} {
  func.func @_identity_alias_kernel(%arg0: memref<2x4x16x16xf32, #tpu.memory_space<any>>, %arg1: memref<2x4x16x16xf32, #tpu.memory_space<any>>) attributes {dimension_semantics = [], scalar_prefetch = 0 : i64, scratch_operands = 0 : i64, tpu.core_type = #tpu.core_type<tc>} {
    return
  }
}

</mosaic_0001>

<bundles_post_ra>
// kernel: _gru_net_forward_aliased.1
= control target key start
LH: loop header
LB: loop body
LE: loop exit
PB: predicated region body
PF: predicated region fallthrough
CT: control target
= control target key end

     0   :  { %s16_s0 = inlined_call_operand.hbm [shape: f32[2,4,16,16], index: 0, kind: input, shape index: {}, may-alias: {0,1}]   ;;  %s17_s1 = inlined_call_operand.hbm [shape: f32[2,4,16,16], index: 1, kind: output, shape index: {}, may-alias: {0,1}]  }

</bundles_post_ra>
